<compile_context>
chip_gen: v7x
topology: tpu7x:2x2x1
jax: 0.10.0
libtpu: 0.0.40
codegen_flags: <defaults>
</compile_context>

<pallas_src>
import functools
import math

import jax
import jax.numpy as jnp
from jax.experimental import pallas as pl
from jax.experimental.pallas import tpu as pltpu


def _round_up(x: int, m: int) -> int:
    return ((x + m - 1) // m) * m


def _importance_encoder_kernel(idx_ref, wcol_ref, emb_ref, out_ref, *,
                               fuse_scale: bool):
    # idx_ref : (RB, 1)      int32    VMEM -- flattened label indices, this block
    # wcol_ref: (RB, 1)      f32      VMEM -- positional weight per row (constant)
    # emb_ref : (Lp, Ep)     f32/bf16 VMEM -- zero-padded table (resident)
    # out_ref : (RB, Ep)     f32      VMEM -- scaled gathered embeddings
    rb = out_ref.shape[0]
    lp = emb_ref.shape[0]

    lane_iota = jax.lax.broadcasted_iota(jnp.int32, (rb, lp), 1)
    hit = lane_iota == idx_ref[...]

    if fuse_scale:
        # Exact-f32 path: fuse the positional scale into the one-hot select
        # (single nonzero per dot row -> bit-exact vs. torch).
        onehot = jnp.where(hit, wcol_ref[...], 0.0).astype(emb_ref.dtype)
        out_ref[...] = jnp.dot(onehot, emb_ref[...],
                               preferred_element_type=jnp.float32)
    else:
        # bf16 table path: 0/1 one-hot through the MXU, exact f32 scale after.
        onehot = hit.astype(emb_ref.dtype)
        acc = jnp.dot(onehot, emb_ref[...], preferred_element_type=jnp.float32)
        out_ref[...] = acc * wcol_ref[...]


def importance_encoder(x, emb_table, weight, *, row_block: int = 1024,
                       use_bf16: bool = False):
    """x: (B, S) int labels; emb_table: (L, E) f32; weight: (S,) f32."""
    B, S = x.shape
    L, E = emb_table.shape
    if weight.shape[0] != S:
        raise ValueError(f"len(weight)={weight.shape[0]} must equal input_size={S}")
    BS = B * S

    # NOTE: out-of-range / negative indices produce zero rows (zero-padded table)
    # instead of raising like torch.nn.Embedding.

    emb_dtype = jnp.bfloat16 if use_bf16 else jnp.float32
    Lp = _round_up(L, 128)      # one-hot K dim -> full MXU tiles
    Ep = _round_up(E, 128)      # lane dim -> unmasked lane-dense stores
    emb_p = jnp.zeros((Lp, Ep), emb_dtype)
    emb_p = emb_p.at[:L, :E].set(emb_table.astype(emb_dtype))

    # Row blocking over flattened (B*S).  rb is a multiple of lcm(8, S) so the
    # positional-weight pattern is identical for every grid step.
    unit = math.lcm(8, S)
    n_units = -(-BS // unit)
    max_units = max(1, row_block // unit)
    if n_units <= max_units:
        # Fits in one block: still split into 2 when possible so the "parallel"
        # row axis can shard across v7x's two TensorCores (free on v5e/v6e).
        units_per_block = -(-n_units // 2) if n_units >= 2 else 1
    else:
        units_per_block = max_units
    rb = units_per_block * unit
    BSp = _round_up(BS, rb)
    grid = (BSp // rb,)

    idx = jnp.zeros((BSp, 1), jnp.int32)
    idx = idx.at[:BS, 0].set(x.reshape(BS).astype(jnp.int32))

    # Per-row positional weights for ONE row block (rb % S == 0 -> same for all).
    wcol = jnp.tile(weight.astype(jnp.float32), rb // S).reshape(rb, 1)

    # Derived VMEM budget: single-buffered table + wcol, double-buffered idx/out,
    # headroom for the (rb, Lp) one-hot intermediates; clamp to 32 MiB (v7x-safe).
    esz = jnp.dtype(emb_dtype).itemsize
    buf_bytes = (Lp * Ep * esz          # table (Buffered(1))
                 + rb * 4               # wcol (Buffered(1))
                 + 2 * rb * 4           # idx (double-buffered)
                 + 2 * rb * Ep * 4      # output (double-buffered)
                 + 2 * rb * Lp * 4)     # one-hot / iota spill headroom
    vmem_limit = int(min(32 * 1024 * 1024, max(2 * buf_bytes, 8 * 1024 * 1024)))

    flops = 2 * BSp * Lp * Ep
    bytes_accessed = int(Lp * Ep * esz + 4 * (BSp + rb + BSp * Ep))

    kernel = functools.partial(_importance_encoder_kernel,
                               fuse_scale=not use_bf16)

    out = pl.pallas_call(
        kernel,
        out_shape=jax.ShapeDtypeStruct((BSp, Ep), jnp.float32),
        grid=grid,
        in_specs=[
            # Row-block of flattened indices.
            pl.BlockSpec((rb, 1), lambda i: (i, 0)),
            # Constant positional-weight column: fetched once, single-buffered.
            pl.BlockSpec((rb, 1), lambda i: (0, 0), pipeline_mode=pl.Buffered(1)),
            # Resident table: constant index_map, single-buffered.
            pl.BlockSpec((Lp, Ep), lambda i: (0, 0), pipeline_mode=pl.Buffered(1)),
        ],
        out_specs=pl.BlockSpec((rb, Ep), lambda i: (i, 0)),
        compiler_params=pltpu.CompilerParams(
            dimension_semantics=("parallel",),
            vmem_limit_bytes=vmem_limit,
        ),
        cost_estimate=pl.CostEstimate(flops=flops, transcendentals=0,
                                      bytes_accessed=bytes_accessed),
    )(idx, wcol, emb_p)

    # Strip row/lane padding, flatten row-major: identical to torch's
    # (B, S, E).view(-1, S*E).
    return out[:BS, :E].reshape(B, S * E)


if __name__ == "__main__":
    # Module hyperparameters (small, consistent with the torch module defaults).
    num_labels = 32
    embed_dim = 32
    input_size = 5
    weight_list = [1.0, 2.0, 3.0, 4.0, 5.0]
    batch = 16   # BS = 80 -> two row blocks of 40 (= lcm(8, 5)) -> grid of 2

    key = jax.random.PRNGKey(0)
    k_emb, k_idx = jax.random.split(key)

    # Deterministic "parameters": embedding table ~ N(0, 1) like nn.Embedding init.
    emb_table = jax.random.normal(k_emb, (num_labels, embed_dim), dtype=jnp.float32)
    weight = jnp.asarray(weight_list, dtype=jnp.float32)

    # Example input labels.
    x = jax.random.randint(k_idx, (batch, input_size), 0, num_labels,
                           dtype=jnp.int32)

    # Pure-JAX reference.
    ref = (emb_table[x] * weight[None, :, None]).reshape(
        batch, input_size * embed_dim)

    # Exact-f32 path (bit parity with the torch module).
    out = jax.block_until_ready(importance_encoder(x, emb_table, weight))
    assert out.shape == (batch, input_size * embed_dim)
    assert jnp.allclose(out, ref, atol=1e-5, rtol=1e-5)

    # bf16-table path (v6e/v7x MXU-friendly), looser tolerance from quantization.
    out_bf16 = jax.block_until_ready(
        importance_encoder(x, emb_table, weight, use_bf16=True))
    assert jnp.allclose(out_bf16, ref, atol=1e-1, rtol=5e-2)

    print("KERNEL_OK")
</pallas_src>

<mosaic_0001>
module attributes {stable_mosaic.version = 11 : i64} {
  func.func @_importance_encoder_kernel(%arg0: i32, %arg1: memref<40x1xi32, #tpu.memory_space<vmem>>, %arg2: memref<40x1xf32, #tpu.memory_space<vmem>>, %arg3: memref<128x128xf32, #tpu.memory_space<vmem>>, %arg4: memref<40x128xf32, #tpu.memory_space<vmem>>) attributes {dimension_semantics = [#tpu.dimension_semantics<parallel>], iteration_bounds = array<i64: 2>, scalar_prefetch = 0 : i64, scratch_operands = 0 : i64, tpu.core_type = #tpu.core_type<tc>, window_params = [{transform_indices = @transform_0, window_bounds = array<i64: 40, 1>}, {pipeline_mode = #tpu.pipeline_mode<synchronous>, transform_indices = @transform_1, window_bounds = array<i64: 40, 1>}, {pipeline_mode = #tpu.pipeline_mode<synchronous>, transform_indices = @transform_2, window_bounds = array<i64: 128, 128>}, {transform_indices = @transform_3, window_bounds = array<i64: 40, 128>}]} {
    %0 = tpu.iota {dimensions = array<i32: 1>} : vector<40x128xi32>
    %c0 = arith.constant 0 : index
    %c0_0 = arith.constant 0 : index
    %1 = vector.load %arg1[%c0, %c0_0] : memref<40x1xi32, #tpu.memory_space<vmem>>, vector<40x1xi32>
    %2 = vector.broadcast %1 : vector<40x1xi32> to vector<40x128xi32>
    %3 = arith.cmpi eq, %0, %2 : vector<40x128xi32>
    %c0_1 = arith.constant 0 : index
    %c0_2 = arith.constant 0 : index
    %4 = vector.load %arg2[%c0_1, %c0_2] : memref<40x1xf32, #tpu.memory_space<vmem>>, vector<40x1xf32>
    %cst = arith.constant 0.000000e+00 : f32
    %5 = vector.shape_cast %4 : vector<40x1xf32> to vector<40x1xf32>
    %6 = vector.broadcast %5 : vector<40x1xf32> to vector<40x128xf32>
    %7 = vector.broadcast %cst : f32 to vector<40x128xf32>
    %8 = arith.select %3, %6, %7 : vector<40x128xi1>, vector<40x128xf32>
    %c0_3 = arith.constant 0 : index
    %c0_4 = arith.constant 0 : index
    %9 = vector.load %arg3[%c0_3, %c0_4] : memref<128x128xf32, #tpu.memory_space<vmem>>, vector<128x128xf32>
    %cst_5 = arith.constant dense<0.000000e+00> : vector<40x128xf32>
    %10 = tpu.matmul %8, %9, %cst_5 {dimension_numbers = #tpu.dot_dimension_numbers<[1], [0], [0], [1], [0, 0, 1, 1], [], []>} : vector<40x128xf32>, vector<128x128xf32>, vector<40x128xf32> -> vector<40x128xf32>
    %c0_6 = arith.constant 0 : index
    %c0_7 = arith.constant 0 : index
    %11 = vector.load %arg4[%c0_6, %c0_7] : memref<40x128xf32, #tpu.memory_space<vmem>>, vector<40x128xf32>
    tpu.vector_store %arg4[%c0_6, %c0_7], %10 {strides = array<i32>} : memref<40x128xf32, #tpu.memory_space<vmem>>, vector<40x128xf32>,
    return
  }
  func.func @transform_0(%arg0: i32) -> (i32, i32) {
    %c0_i32 = arith.constant 0 : i32
    %c0_i32_0 = arith.constant 0 : i32
    return %arg0, %c0_i32 : i32, i32
  }
  func.func @transform_1(%arg0: i32) -> (i32, i32) {
    %c0_i32 = arith.constant 0 : i32
    %c0_i32_0 = arith.constant 0 : i32
    %c0_i32_1 = arith.constant 0 : i32
    return %c0_i32, %c0_i32_0 : i32, i32
  }
  func.func @transform_2(%arg0: i32) -> (i32, i32) {
    %c0_i32 = arith.constant 0 : i32
    %c0_i32_0 = arith.constant 0 : i32
    %c0_i32_1 = arith.constant 0 : i32
    return %c0_i32, %c0_i32_0 : i32, i32
  }
  func.func @transform_3(%arg0: i32) -> (i32, i32) {
    %c0_i32 = arith.constant 0 : i32
    %c0_i32_0 = arith.constant 0 : i32
    return %arg0, %c0_i32 : i32, i32
  }
}

</mosaic_0001>

<bundles_post_ra>
// kernel: tpu_custom_call.1
= control target key start
LH: loop header
LB: loop body
LE: loop exit
PB: predicated region body
PF: predicated region fallthrough
CT: control target
= control target key end

     0   :  { %8 = vsyncpa [#allocation3], 0  ;;  %s873_s0 = inlined_call_operand.vmem [shape: s32[80,1], index: 0, kind: input, shape index: {}]   ;;  %s874_s1 = inlined_call_operand.vmem [shape: f32[40,1], index: 1, kind: input, shape index: {}]   ;;  %s875_s2 = inlined_call_operand.vmem [shape: f32[128,128], index: 2, kind: input, shape index: {}]   ;;  %s876_s3 = inlined_call_operand.hbm [shape: f32[80,128], index: 3, kind: output, shape index: {}]  }
   0x1   :  { %10 = vsyncpa [#allocation3 + $0x1], 0  ;;  %s682_s12 = smov 0   ;;  %s684_s13 = smov 0  }
   0x2   :  { %s686_s14 = smov 0   ;;  %s688_s15 = smov 0  }
   0x3 LB: > { %s703_s16 = sadd.s32 4294967295, %s653_s15   ;;  %s421_s17 = sadd.s32 4294967294, %s653_s15   ;;  %s653_s15 = sphi %s688_s15, %s882_s15   ;;  %s649_s14 = sphi %s686_s14, %s881_s14   ;;  %s645_s13 = sphi %s684_s13, %s880_s13   ;;  %s641_s12 = sphi %s682_s12, %s879_s12  }
   0x4   : > { %s707_s18 = sadd.s32 1, %s653_s15   ;;  %s91_s19 = sadd.s32 1, %s649_s14 }
   0x5   : > { %s88_s20 = ssub.s32 %s653_s15, %s707_s18  ;;  %p101_p0 = scmp.ne.s32.totalorder %s649_s14, %s645_s13 }
   0x6   : > { %p89_p1 = scmp.eq.s32.totalorder %s88_s20, 0  ;;  %p102_p2 = scmp.eq.s32.totalorder %s703_s16, 1 }
   0x7   : > { %p107_p3 = scmp.ne.s32.totalorder %s645_s13, %s641_s12  ;;  %p108_p4 = scmp.eq.s32.totalorder %s421_s17, 1 }
   0x8   : > { %s718_s21 = scalar_select %p89_p1, %s649_s14, %s91_s19  }
   0x9   : > { %p720_p5 = por %p102_p2, %p101_p0  ;;  %p724_p6 = por %p108_p4, %p107_p3 }
   0xa   : > { %p424_p7 = scmp.ge.s32.totalorder %s653_s15, 1  ;;  %p141_p8 = scmp.lt.s32.totalorder %s653_s15, 3 }
   0xc   : > { %p142_p9 = pnand %p424_p7, %p141_p8 }
   0xd   : > { %v202_v0 = vld [vmem:[%s874_s1 + $0x18] sm:$0xff] (!%p142_p9)  ;;  %v199_v1 = vld [vmem:[%s874_s1] sm:$0xff] (!%p142_p9)  ;;  %s165_s28 = smul.u32 (!%p142_p9), 5, %s703_s16  ;;  %v655_v2 = vmov (!%p142_p9), 0   ;;  %v235_v4 = vld [vmem:[%s875_s2 + $0x8] sm:$0xff] (!%p142_p9)  ;;  %v656_v5 = vmov (!%p142_p9), 0.0|0.0   ;;  %v172_v37 = vlaneseq (!%p142_p9) }
   0xe   : > { %145 = sbr.rel (%p142_p9) target bundleno = 392 (0x188), region = 32  ;;  %590 = vset.pattern.permute.xlu1 (!%p142_p9), %v655_v2  ;;  %589 = vset.pattern.permute.xlu0 (!%p142_p9), %v655_v2  ;;  %v234_v3 = vld [vmem:[%s875_s2] sm:$0xff] (!%p142_p9)  ;;  %v236_v7 = vld [vmem:[%s875_s2 + $0x10] sm:$0xff] (!%p142_p9)  ;;  %v237_v8 = vld [vmem:[%s875_s2 + $0x18] sm:$0xff] (!%p142_p9)  ;;  %vm657_vm0 = vmmov (!%p142_p9), 0   ;;  %v658_v19 = vmov (!%p142_p9), 0.0  }
   0xf   : > { %221 = vperm.xlu1 (!%p142_p9), %590, %v202_v0   ;;  %206 = vperm.xlu0 (!%p142_p9), %589, %v199_v1   ;;  %p166_p10 = scmp.lt.s32.totalorder (!%p142_p9), %s165_s28, 9  ;;  %v504_v6 = vpack.c.bf16 (!%p142_p9), %v235_v4, %v234_v3  ;;  %v507_v9 = vpack.c.bf16 (!%p142_p9), %v237_v8, %v236_v7  ;;  %v238_v10 = vld [vmem:[%s875_s2 + $0x20] sm:$0xff] (!%p142_p9)  ;;  %v239_v11 = vld [vmem:[%s875_s2 + $0x28] sm:$0xff] (!%p142_p9)  ;;  %v240_v17 = vld [vmem:[%s875_s2 + $0x30] sm:$0xff] (!%p142_p9)  ;;  %v173_v40 = vand.u32 (!%p142_p9), 127, %v172_v37  ;;  %s162_s8 = sand.u32 (!%p142_p9), 1, %s645_s13  }
  0x10   : > { %503 = vmatprep.subr.bf16.mxu0 (!%p142_p9), %v656_v5  ;;  %527 = vmatprep.subr.bf16.mxu1 (!%p142_p9), %v656_v5  ;;  %v200_v15 = vld [vmem:[%s874_s1 + $0x8] sm:$0xff] (!%p142_p9)  ;;  %v510_v16 = vpack.c.bf16 (!%p142_p9), %v239_v11, %v238_v10  ;;  %v241_v18 = vld [vmem:[%s875_s2 + $0x38] sm:$0xff] (!%p142_p9)  ;;  %v242_v23 = vld [vmem:[%s875_s2 + $0x40] sm:$0xff] (!%p142_p9)  ;;  %s543_s9 = smul.u32 (!%p142_p9), 40, %s162_s8  ;;  %s832_s25 = scalar_lea.sflag (!%p142_p9), [#allocation3], %s162_s8 }
  0x11   : > { %505 = vmatpush3.bf16.msra.mxu0 (!%p142_p9), %v504_v6  ;;  %535 = vmatpush3.bf16.msra.mxu1 (!%p142_p9), %v504_v6  ;;  %v513_v22 = vpack.c.bf16 (!%p142_p9), %v241_v18, %v240_v17  ;;  %v243_v24 = vld [vmem:[%s875_s2 + $0x48] sm:$0xff] (!%p142_p9)  ;;  %v203_v25 = vld [vmem:[%s874_s1 + $0x20] sm:$0xff] (!%p142_p9)  ;;  %v201_v26 = vld [vmem:[%s874_s1 + $0x10] sm:$0xff] (!%p142_p9)  ;;  %s434_s11 = smul.u32 (!%p142_p9), 640, %s703_s16  ;;  %s659_s26 = smov (!%p142_p9), [#allocation2]  }
  0x12   : > { %506 = vmatprep.subr.bf16.mxu0 (!%p142_p9), %v656_v5  ;;  %528 = vmatprep.subr.bf16.mxu1 (!%p142_p9), %v656_v5  ;;  %v516_v27 = vpack.c.bf16 (!%p142_p9), %v243_v24, %v242_v23  ;;  %v244_v28 = vld [vmem:[%s875_s2 + $0x50] sm:$0xff] (!%p142_p9)  ;;  %v245_v29 = vld [vmem:[%s875_s2 + $0x58] sm:$0xff] (!%p142_p9)  ;;  %v246_v31 = vld [vmem:[%s875_s2 + $0x60] sm:$0xff] (!%p142_p9)  ;;  %s595_s27 = sshll.u32 (!%p142_p9), %s659_s26, 4  ;;  %s596_s27 = int_to_ptr.vmem [resolvable:$false] %s595_s27 }
  0x13   : > { %488 = vmatprep.mubr.msk.f32.mxu0 (!%p142_p9), %vm657_vm0, %v658_v19  ;;  %497 = vmatprep.mubr.msk.f32.mxu1 (!%p142_p9), %vm657_vm0, %v658_v19  ;;  %v519_v30 = vpack.c.bf16 (!%p142_p9), %v245_v29, %v244_v28  ;;  %v247_v32 = vld [vmem:[%s875_s2 + $0x68] sm:$0xff] (!%p142_p9)  ;;  %v248_v34 = vld [vmem:[%s875_s2 + $0x70] sm:$0xff] (!%p142_p9)  ;;  %v249_v35 = vld [vmem:[%s875_s2 + $0x78] sm:$0xff] (!%p142_p9)  ;;  %s830_s24 = scalar_lea.hbm (!%p142_p9), %s876_s3, %s434_s11 }
  0x14   : > { %v522_v33 = vpack.c.bf16 (!%p142_p9), %v247_v32, %v246_v31  ;;  %v525_v36 = vpack.c.bf16 (!%p142_p9), %v249_v35, %v248_v34 }
  0x15   : > { %s884_s28 = smov (!%p166_p10, %s165_s28), 9  ;;  %508 = vmatpush3.bf16.msra.mxu0 %v507_v9  ;;  %536 = vmatpush3.bf16.msra.mxu1 %v507_v9 }
  0x16   : > { %s425_s10 = sshll.u32 %s884_s28, 3  ;;  %509 = vmatprep.subr.bf16.mxu0 %v656_v5  ;;  %529 = vmatprep.subr.bf16.mxu1 %v656_v5  ;;  %s597_s28 = scalar_lea.vmem %s596_s27, 1280 }
  0x17   : > { %s169_s19 = scalar_lea.vmem %s873_s0, %s425_s10  ;;  %s164_s10 = scalar_lea.vmem [#allocation2], %s543_s9 }
  0x18   : > { %v175_v12 = vld [vmem:[%s169_s19 + $0x8] sm:$0xff]  ;;  %v174_v13 = vld [vmem:[%s169_s19] sm:$0xff]  ;;  %v177_v14 = vld [vmem:[%s169_s19 + $0x18] sm:$0xff]  ;;  %s359_s17 = sshll.u32 %s164_s10, 4  ;;  %s825_s17 = int_to_ptr.vmem [resolvable:$true] %s359_s17 }
  0x19   : > { %183 = vperm.xlu1 %590, %v175_v12   ;;  %180 = vperm.xlu0 %589, %v174_v13   ;;  %v178_v20 = vld [vmem:[%s169_s19 + $0x20] sm:$0xff]  ;;  %v176_v21 = vld [vmem:[%s169_s19 + $0x10] sm:$0xff]  ;;  %s591_s16 = scalar_lea.vmem %s825_s17, 640  ;;  %p598_p0 = scmp.lt.s32.totalorder %s825_s17, %s596_s27 }
  0x1a   : > { %511 = vmatpush3.bf16.msra.mxu0 %v510_v16  ;;  %537 = vmatpush3.bf16.msra.mxu1 %v510_v16  ;;  %p592_p11 = scmp.ne.s32.totalorder %s825_s17, %s591_s16  ;;  %p599_p1 = scmp.lt.s32.totalorder %s597_s28, %s591_s16 }
  0x1b   : > { %512 = vmatprep.subr.bf16.mxu0 %v656_v5  ;;  %530 = vmatprep.subr.bf16.mxu1 %v656_v5 }
  0x1c   : > { %p593_p12 = pnand %p592_p11, %p720_p5  ;;  %p600_p2 = por %p599_p1, %p598_p0 }
  0x1d   : > { %189 = vperm.xlu1 %590, %v177_v14   ;;  %211 = vperm.xlu0 %589, %v200_v15  }
  0x1e   : > { %514 = vmatpush3.bf16.msra.mxu0 %v513_v22  ;;  %538 = vmatpush3.bf16.msra.mxu1 %v513_v22  ;;  %p594_p13 = pneg %p593_p12 }
  0x1f   : > { %515 = vmatprep.subr.bf16.mxu0 %v656_v5  ;;  %531 = vmatprep.subr.bf16.mxu1 %v656_v5 }
  0x20   : > { %p601_p3 = pnand %p600_p2, %p594_p13 }
  0x21   : > { %192 = vperm.xlu1 %590, %v178_v20   ;;  %186 = vperm.xlu0 %589, %v176_v21  }
  0x22   : > { %517 = vmatpush3.bf16.msra.mxu0 %v516_v27  ;;  %539 = vmatpush3.bf16.msra.mxu1 %v516_v27 }
  0x23   : > { %518 = vmatprep.subr.bf16.mxu0 %v656_v5  ;;  %532 = vmatprep.subr.bf16.mxu1 %v656_v5 }
  0x25   : > { %226 = vperm.xlu1 %590, %v203_v25   ;;  %216 = vperm.xlu0 %589, %v201_v26  }
  0x26   : > { %520 = vmatpush3.bf16.msra.mxu0 %v519_v30  ;;  %540 = vmatpush3.bf16.msra.mxu1 %v519_v30 }
  0x27   : > { %521 = vmatprep.subr.bf16.mxu0 %v656_v5  ;;  %533 = vmatprep.subr.bf16.mxu1 %v656_v5 }
  0x2a   : > { %523 = vmatpush3.bf16.msra.mxu0 %v522_v33  ;;  %541 = vmatpush3.bf16.msra.mxu1 %v522_v33 }
  0x2b   : > { %524 = vmatprep.subr.bf16.mxu0 %v656_v5  ;;  %534 = vmatprep.subr.bf16.mxu1 %v656_v5 }
  0x2e   : > { %526 = vmatpush3.bf16.msra.mxu0 %v525_v36  ;;  %542 = vmatpush3.bf16.msra.mxu1 %v525_v36 }
  0x8e   : > { %v222_v38 = vpop.permute.xlu1 %221  ;;  %v207_v39 = vpop.permute.xlu0 %206 }
  0x98   : > { %v184_v41 = vpop.permute.xlu1 %183  ;;  %v181_v42 = vpop.permute.xlu0 %180 }
  0x99   : > { %vm194_vm1 = vcmp.eq.s32.totalorder %v173_v40, %v181_v42  ;;  %vm195_vm2 = vcmp.eq.s32.totalorder %v173_v40, %v184_v41 }
  0x9a   : > { %489 = vmatmul.mubr.msk.f32.vlgmr.msra.gmra.mrb[0].mxu0 %vm194_vm1, %v207_v39 }
  0x9b   : > { %491 = vmatprep.mubr.msk.f32.mxu0 %vm657_vm0, %v658_v19 }
  0x9c   : > { %v190_v43 = vpop.permute.xlu1 %189  ;;  %v212_v44 = vpop.permute.xlu0 %211 }
  0x9d   : > { %vm197_vm3 = vcmp.eq.s32.totalorder %v173_v40, %v190_v43 }
  0x9e   : > { %492 = vmatmul.mubr.msk.f32.gmra.mrb[2].mxu0 %vm195_vm2, %v212_v44  ;;  %498 = vmatmul.mubr.msk.f32.vlgmr.msra.gmra.mrb[0].mxu1 %vm197_vm3, %v222_v38 }
  0x9f   : > { %500 = vmatprep.mubr.msk.f32.mxu1 %vm657_vm0, %v658_v19  ;;  %494 = vmatprep.mubr.msk.f32.mxu0 %vm657_vm0, %v658_v19 }
  0xa0   : > { %v193_v45 = vpop.permute.xlu1 %192  ;;  %v187_v46 = vpop.permute.xlu0 %186 }
  0xa1   : > { %vm198_vm4 = vcmp.eq.s32.totalorder %v173_v40, %v193_v45  ;;  %vm196_vm5 = vcmp.eq.s32.totalorder %v173_v40, %v187_v46 }
  0xa4   : > { %v227_v47 = vpop.permute.xlu1 %226  ;;  %v217_v48 = vpop.permute.xlu0 %216 }
  0xa5   : > { %495 = vmatmul.mubr.msk.f32.gmra.mrb[4].mxu0 %vm196_vm5, %v217_v48  ;;  %501 = vmatmul.mubr.msk.f32.gmra.mrb[2].mxu1 %vm198_vm4, %v227_v47 }
 0x16d   : > { %v316_v49 = vpop.f32.mrb[0].mxu0 }
 0x16e   : > { %340 = vst [vmem:[%s164_s10] sm:$0xff] %v316_v49  ;;  %v490_v50 = vpop.f32.mrb[1].mxu0 }
 0x171   : > { %v321_v51 = vpop.f32.mrb[2].mxu0  ;;  %v331_v52 = vpop.f32.mrb[0].mxu1 }
 0x172   : > { %341 = vst [vmem:[%s164_s10 + $0x8] sm:$0xff] %v321_v51  ;;  %343 = vst [vmem:[%s164_s10 + $0x18] sm:$0xff] %v331_v52  ;;  %v493_v53 = vpop.f32.mrb[3].mxu0  ;;  %v499_v54 = vpop.f32.mrb[1].mxu1 }
 0x178   : > { %v326_v55 = vpop.f32.mrb[4].mxu0  ;;  %v336_v56 = vpop.f32.mrb[2].mxu1 }
 0x179   : > { %342 = vst [vmem:[%s164_s10 + $0x10] sm:$0xff] %v326_v55  ;;  %344 = vst [vmem:[%s164_s10 + $0x20] sm:$0xff] %v336_v56  ;;  %v496_v57 = vpop.f32.mrb[5].mxu0  ;;  %v502_v58 = vpop.f32.mrb[3].mxu1 }
 0x17a   : > { %604 = shalt.err (!%p601_p3)
}
 0x17b   : > { %s605_s29 = scalar_lea.hbm %s830_s24, 640  ;;  %s609_s5 = scalar_lea.hbm %s876_s3, 1280 }
 0x17c   : > { %p606_p4 = scmp.ne.s32.totalorder %s830_s24, %s605_s29  ;;  %p610_p9 = scmp.lt.u32.totalorder %s830_s24, %s876_s3 }
 0x17d   : > { %p611_p10 = scmp.lt.u32.totalorder %s609_s5, %s605_s29  ;;  %p613_p12 = scmp.lt.u32.totalorder %s605_s29, %s830_s24 }
 0x17e   : > { %p607_p7 = pnand %p606_p4, %p720_p5 }
 0x17f   : > { %p612_p11 = por %p611_p10, %p610_p9 }
 0x180   : > { %p608_p8 = pneg %p607_p7 }
 0x181   : > { %p614_p13 = por %p613_p12, %p612_p11 }
 0x183   : > { %p615_p0 = pnand %p614_p13, %p608_p8 }
 0x185   : > { %618 = shalt.err (!%p615_p0)
}
 0x186   : > { %s660_s8 = smov 128   ;;  %s661_s9 = smov 8  }
 0x187   : > { %544 = dma.vmem_to_hbm [thread:$0]  (%p720_p5), %s825_s17, 640, %s830_s24, %s832_s25, %s660_s8, %s660_s8, %s661_s9  }
 0x188 PF: > { %p550_p1 = scmp.ge.s32.totalorder %s653_s15, 2  ;;  %s374_s10 = sand.u32 1, %s641_s12  }
 0x189   : > { %s375_s11 = scalar_lea.sflag [#allocation3], %s374_s10 }
 0x18a   : > { %p547_p2 = pnand %p550_p1, %p724_p6 }
 0x18c   : > { %636 = dma.done.wait (!%p547_p2), %s375_s11, 640  }
 0x18d   : > { %638 = vsyncadd (!%p547_p2), %s375_s11, 4294966656  ;;  %p13_p3 = scmp.ge.s32.totalorder %s707_s18, 4   ;;  %s879_s12 = smov %s645_s13 }
 0x18e   : > { %s880_s13 = smov %s649_s14  ;;  %s881_s14 = smov %s718_s21 }
 0x18f   : > { %s882_s15 = smov %s707_s18  ;;  %15 = sbr.rel (!%p13_p3) target bundleno = 3 (0x3), region = 67 }
 0x196   :  { %380 = vsyncpa [#allocation3], 1 }
 0x197   :  { %382 = vsyncpa [#allocation3 + $0x1], 1 }

</bundles_post_ra>
